<compile_context>
chip_gen: v7x
topology: tpu7x:2x2x1
jax: 0.10.0
libtpu: 0.0.40
codegen_flags: <defaults>
</compile_context>

<pallas_src>
import functools

import jax
import jax.numpy as jnp
from jax.experimental import pallas as pl
from jax.experimental.pallas import tpu as pltpu

_CHUNK = 128                      # lanes per in-kernel sub-tile
_NT = (((1,), (1,)), ((), ()))    # dot_general dims: contract minor dims of both


def dqn_kernel(x_ref, w1_ref, b1_ref, w2_ref, b2_ref, w3_ref, b3_ref, o_ref,
               *, n_chunks):
    # x_ref: (TB, 9) batch-major block straight from the (B, 9) input.
    # o_ref: (9, TB) feature-major block (lane axis = batch -> lane-dense stores).
    w1 = w1_ref[...]              # (24, 9)
    w2 = w2_ref[...]              # (24, 24)
    w3 = w3_ref[...]              # (9, 24)
    # Hoist bias lane-broadcasts out of the chunk loop.
    b1 = jnp.broadcast_to(b1_ref[...], (w1.shape[0], _CHUNK))
    b2 = jnp.broadcast_to(b2_ref[...], (w2.shape[0], _CHUNK))
    b3 = jnp.broadcast_to(b3_ref[...], (w3.shape[0], _CHUNK))

    def body(c, carry):
        start = pl.multiple_of(c * _CHUNK, _CHUNK)
        xb = x_ref[pl.ds(start, _CHUNK), :]                       # (128, 9)
        # fc1: contract the two size-9 minor dims -> feature-major (24, 128).
        h1 = jax.lax.dot_general(w1, xb, _NT,
                                 preferred_element_type=jnp.float32)
        h1 = jnp.maximum(h1 + b1, 0.0)
        # fc2: (24, 24) @ (24, 128) -> (24, 128)
        h2 = jnp.dot(w2, h1, preferred_element_type=jnp.float32)
        h2 = jnp.maximum(h2 + b2, 0.0)
        # fc3 (no activation): (9, 24) @ (24, 128) -> (9, 128)
        out = jnp.dot(w3, h2, preferred_element_type=jnp.float32) + b3
        o_ref[:, pl.ds(start, _CHUNK)] = out.astype(o_ref.dtype)
        return carry

    jax.lax.fori_loop(0, n_chunks, body, None, unroll=True)


@functools.partial(jax.jit, static_argnames=("tb", "feature_major_output"))
def dqn_forward(x, params, *, tb=2048, feature_major_output=False):
    """x: (B, 9) float32 (PyTorch convention). Returns (B, 9), or (9, B) if
    feature_major_output=True (lets a fused consumer skip the back-transpose)."""
    w1, b1, w2, b2, w3, b3 = params     # torch layout: W (out, in), b (out, 1)
    B, F = x.shape
    assert F == w1.shape[1]

    # --- batch tiling ---------------------------------------------------------
    units = pl.cdiv(B, _CHUNK)                  # number of 128-lane units
    max_units = max(tb // _CHUNK, 1)            # units per grid step (upper bound)
    n_blocks = pl.cdiv(units, max_units)
    if n_blocks == 1 and units >= 2:
        n_blocks = 2                            # keep both v7x TensorCores busy
    blk_units = pl.cdiv(units, n_blocks)        # balanced block size
    n_blocks = pl.cdiv(units, blk_units)
    TB = blk_units * _CHUNK                     # lanes per grid step (mult of 128)

    const = lambda arr: pl.BlockSpec(arr.shape, lambda i: (0, 0))

    flops = 2 * B * (9 * 24 + 24 * 24 + 24 * 9)
    weight_bytes = sum(int(a.size) * 4 for a in (w1, b1, w2, b2, w3, b3))
    bytes_accessed = B * (9 + 9) * 4 + weight_bytes

    out_fm = pl.pallas_call(
        functools.partial(dqn_kernel, n_chunks=blk_units),
        out_shape=jax.ShapeDtypeStruct((9, B), jnp.float32),
        grid_spec=pltpu.PrefetchScalarGridSpec(
            num_scalar_prefetch=0,
            grid=(n_blocks,),
            in_specs=[
                pl.BlockSpec((TB, 9), lambda i: (i, 0)),   # x in native (B, 9) rows
                const(w1), const(b1),
                const(w2), const(b2),
                const(w3), const(b3),
            ],
            out_specs=pl.BlockSpec((9, TB), lambda i: (0, i)),
        ),
        compiler_params=pltpu.CompilerParams(
            dimension_semantics=("parallel",),              # batch axis -> both TCs on v7x
        ),
        cost_estimate=pl.CostEstimate(
            flops=flops, transcendentals=0, bytes_accessed=bytes_accessed
        ),
    )(x, w1, b1, w2, b2, w3, b3)

    if feature_major_output:
        return out_fm
    # Back-transpose only because the PyTorch module returns (B, 9).
    return jnp.transpose(out_fm)


def init_params(key):
    # PyTorch nn.Linear default init: U(-1/sqrt(fan_in), 1/sqrt(fan_in)).
    # Stored torch-native: W (out_features, in_features), b (out_features, 1).
    def linear(key, fan_in, fan_out):
        kw, kb = jax.random.split(key)
        bound = 1.0 / jnp.sqrt(fan_in)
        w = jax.random.uniform(kw, (fan_out, fan_in), jnp.float32, -bound, bound)
        b = jax.random.uniform(kb, (fan_out, 1), jnp.float32, -bound, bound)
        return w, b

    k1, k2, k3 = jax.random.split(key, 3)
    w1, b1 = linear(k1, 9, 24)
    w2, b2 = linear(k2, 24, 24)
    w3, b3 = linear(k3, 24, 9)
    return w1, b1, w2, b2, w3, b3


def dqn_ref(x, params):
    w1, b1, w2, b2, w3, b3 = params
    h1 = jnp.maximum(x @ w1.T + b1.T, 0.0)
    h2 = jnp.maximum(h1 @ w2.T + b2.T, 0.0)
    return h2 @ w3.T + b3.T


if __name__ == "__main__":
    key = jax.random.PRNGKey(0)
    pkey, xkey = jax.random.split(key)
    params = init_params(pkey)

    # 256 boards of 3*3 = 9 features: two 128-lane grid steps (both TCs on v7x).
    B = 256
    x = jax.random.uniform(xkey, (B, 9), jnp.float32, -1.0, 1.0)
    out = jax.block_until_ready(dqn_forward(x, params))
    ref = dqn_ref(x, params)
    assert out.shape == (B, 9)
    assert jnp.allclose(out, ref, atol=1e-5, rtol=1e-5)

    # Tiny batch (single partial block, no host-side padding).
    x_small = jax.random.uniform(jax.random.PRNGKey(1), (8, 9), jnp.float32, -1.0, 1.0)
    out_small = jax.block_until_ready(dqn_forward(x_small, params))
    assert jnp.allclose(out_small, dqn_ref(x_small, params), atol=1e-5, rtol=1e-5)

    # Ragged multi-block batch (partial last block, 2 grid steps x 2 chunks).
    x_odd = jax.random.uniform(jax.random.PRNGKey(2), (300, 9), jnp.float32, -1.0, 1.0)
    out_odd = jax.block_until_ready(dqn_forward(x_odd, params))
    assert jnp.allclose(out_odd, dqn_ref(x_odd, params), atol=1e-5, rtol=1e-5)

    print("KERNEL_OK")
</pallas_src>

<mosaic_0001>
module attributes {stable_mosaic.version = 11 : i64} {
  func.func @dqn_kernel(%arg0: i32, %arg1: memref<128x9xf32, #tpu.memory_space<vmem>>, %arg2: memref<24x9xf32, #tpu.memory_space<vmem>>, %arg3: memref<24x1xf32, #tpu.memory_space<vmem>>, %arg4: memref<24x24xf32, #tpu.memory_space<vmem>>, %arg5: memref<24x1xf32, #tpu.memory_space<vmem>>, %arg6: memref<9x24xf32, #tpu.memory_space<vmem>>, %arg7: memref<9x1xf32, #tpu.memory_space<vmem>>, %arg8: memref<9x128xf32, #tpu.memory_space<vmem>>) attributes {dimension_semantics = [#tpu.dimension_semantics<parallel>], iteration_bounds = array<i64: 2>, scalar_prefetch = 0 : i64, scratch_operands = 0 : i64, tpu.core_type = #tpu.core_type<tc>, window_params = [{transform_indices = @transform_0, window_bounds = array<i64: 128, 9>}, {pipeline_mode = #tpu.pipeline_mode<synchronous>, transform_indices = @transform_1, window_bounds = array<i64: 24, 9>}, {pipeline_mode = #tpu.pipeline_mode<synchronous>, transform_indices = @transform_2, window_bounds = array<i64: 24, 1>}, {pipeline_mode = #tpu.pipeline_mode<synchronous>, transform_indices = @transform_3, window_bounds = array<i64: 24, 24>}, {pipeline_mode = #tpu.pipeline_mode<synchronous>, transform_indices = @transform_4, window_bounds = array<i64: 24, 1>}, {pipeline_mode = #tpu.pipeline_mode<synchronous>, transform_indices = @transform_5, window_bounds = array<i64: 9, 24>}, {pipeline_mode = #tpu.pipeline_mode<synchronous>, transform_indices = @transform_6, window_bounds = array<i64: 9, 1>}, {transform_indices = @transform_7, window_bounds = array<i64: 9, 128>}]} {
    %c0 = arith.constant 0 : index
    %c0_0 = arith.constant 0 : index
    %0 = vector.load %arg2[%c0, %c0_0] : memref<24x9xf32, #tpu.memory_space<vmem>>, vector<24x9xf32>
    %c0_1 = arith.constant 0 : index
    %c0_2 = arith.constant 0 : index
    %1 = vector.load %arg4[%c0_1, %c0_2] : memref<24x24xf32, #tpu.memory_space<vmem>>, vector<24x24xf32>
    %c0_3 = arith.constant 0 : index
    %c0_4 = arith.constant 0 : index
    %2 = vector.load %arg6[%c0_3, %c0_4] : memref<9x24xf32, #tpu.memory_space<vmem>>, vector<9x24xf32>
    %c0_5 = arith.constant 0 : index
    %c0_6 = arith.constant 0 : index
    %3 = vector.load %arg3[%c0_5, %c0_6] : memref<24x1xf32, #tpu.memory_space<vmem>>, vector<24x1xf32>
    %4 = vector.shape_cast %3 : vector<24x1xf32> to vector<24x1xf32>
    %5 = vector.broadcast %4 : vector<24x1xf32> to vector<24x128xf32>
    %c0_7 = arith.constant 0 : index
    %c0_8 = arith.constant 0 : index
    %6 = vector.load %arg5[%c0_7, %c0_8] : memref<24x1xf32, #tpu.memory_space<vmem>>, vector<24x1xf32>
    %7 = vector.shape_cast %6 : vector<24x1xf32> to vector<24x1xf32>
    %8 = vector.broadcast %7 : vector<24x1xf32> to vector<24x128xf32>
    %c0_9 = arith.constant 0 : index
    %c0_10 = arith.constant 0 : index
    %9 = vector.load %arg7[%c0_9, %c0_10] : memref<9x1xf32, #tpu.memory_space<vmem>>, vector<9x1xf32>
    %10 = vector.shape_cast %9 : vector<9x1xf32> to vector<9x1xf32>
    %11 = vector.broadcast %10 : vector<9x1xf32> to vector<9x128xf32>
    %c0_i32 = arith.constant 0 : i32
    %c128_i32 = arith.constant 128 : i32
    %12 = arith.muli %c0_i32, %c128_i32 : i32
    %13 = tpu.assume_multiple %12, 128 : i32
    %14 = arith.index_cast %13 : i32 to index
    %c0_11 = arith.constant 0 : index
    %15 = vector.load %arg1[%14, %c0_11] : memref<128x9xf32, #tpu.memory_space<vmem>>, vector<128x9xf32>
    %cst = arith.constant dense<0.000000e+00> : vector<24x128xf32>
    %16 = tpu.matmul %0, %15, %cst {dimension_numbers = #tpu.dot_dimension_numbers<[1], [1], [0], [0], [0, 0, 1, 0], [], []>} : vector<24x9xf32>, vector<128x9xf32>, vector<24x128xf32> -> vector<24x128xf32>
    %17 = arith.addf %16, %5 : vector<24x128xf32>
    %cst_12 = arith.constant 0.000000e+00 : f32
    %18 = vector.broadcast %cst_12 : f32 to vector<24x128xf32>
    %19 = arith.maximumf %17, %18 : vector<24x128xf32>
    %cst_13 = arith.constant dense<0.000000e+00> : vector<24x128xf32>
    %20 = tpu.matmul %1, %19, %cst_13 {dimension_numbers = #tpu.dot_dimension_numbers<[1], [0], [0], [1], [0, 0, 1, 1], [], []>} : vector<24x24xf32>, vector<24x128xf32>, vector<24x128xf32> -> vector<24x128xf32>
    %21 = arith.addf %20, %8 : vector<24x128xf32>
    %cst_14 = arith.constant 0.000000e+00 : f32
    %22 = vector.broadcast %cst_14 : f32 to vector<24x128xf32>
    %23 = arith.maximumf %21, %22 : vector<24x128xf32>
    %cst_15 = arith.constant dense<0.000000e+00> : vector<9x128xf32>
    %24 = tpu.matmul %2, %23, %cst_15 {dimension_numbers = #tpu.dot_dimension_numbers<[1], [0], [0], [1], [0, 0, 1, 1], [], []>} : vector<9x24xf32>, vector<24x128xf32>, vector<9x128xf32> -> vector<9x128xf32>
    %25 = arith.addf %24, %11 : vector<9x128xf32>
    %c0_16 = arith.constant 0 : index
    %26 = arith.index_cast %13 : i32 to index
    %27 = vector.load %arg8[%c0_16, %26] : memref<9x128xf32, #tpu.memory_space<vmem>>, vector<9x128xf32>
    tpu.vector_store %arg8[%c0_16, %26], %25 {strides = array<i32>} : memref<9x128xf32, #tpu.memory_space<vmem>>, vector<9x128xf32>,
    %c1_i32 = arith.constant 1 : i32
    return
  }
  func.func @transform_0(%arg0: i32) -> (i32, i32) {
    %c0_i32 = arith.constant 0 : i32
    %c0_i32_0 = arith.constant 0 : i32
    return %arg0, %c0_i32 : i32, i32
  }
  func.func @transform_1(%arg0: i32) -> (i32, i32) {
    %c0_i32 = arith.constant 0 : i32
    %c0_i32_0 = arith.constant 0 : i32
    %c0_i32_1 = arith.constant 0 : i32
    return %c0_i32, %c0_i32_0 : i32, i32
  }
  func.func @transform_2(%arg0: i32) -> (i32, i32) {
    %c0_i32 = arith.constant 0 : i32
    %c0_i32_0 = arith.constant 0 : i32
    %c0_i32_1 = arith.constant 0 : i32
    return %c0_i32, %c0_i32_0 : i32, i32
  }
  func.func @transform_3(%arg0: i32) -> (i32, i32) {
    %c0_i32 = arith.constant 0 : i32
    %c0_i32_0 = arith.constant 0 : i32
    %c0_i32_1 = arith.constant 0 : i32
    return %c0_i32, %c0_i32_0 : i32, i32
  }
  func.func @transform_4(%arg0: i32) -> (i32, i32) {
    %c0_i32 = arith.constant 0 : i32
    %c0_i32_0 = arith.constant 0 : i32
    %c0_i32_1 = arith.constant 0 : i32
    return %c0_i32, %c0_i32_0 : i32, i32
  }
  func.func @transform_5(%arg0: i32) -> (i32, i32) {
    %c0_i32 = arith.constant 0 : i32
    %c0_i32_0 = arith.constant 0 : i32
    %c0_i32_1 = arith.constant 0 : i32
    return %c0_i32, %c0_i32_0 : i32, i32
  }
  func.func @transform_6(%arg0: i32) -> (i32, i32) {
    %c0_i32 = arith.constant 0 : i32
    %c0_i32_0 = arith.constant 0 : i32
    %c0_i32_1 = arith.constant 0 : i32
    return %c0_i32, %c0_i32_0 : i32, i32
  }
  func.func @transform_7(%arg0: i32) -> (i32, i32) {
    %c0_i32 = arith.constant 0 : i32
    %c0_i32_0 = arith.constant 0 : i32
    return %c0_i32, %arg0 : i32, i32
  }
}

</mosaic_0001>

<bundles_post_ra>
// kernel: dqn_forward.1
= control target key start
LH: loop header
LB: loop body
LE: loop exit
PB: predicated region body
PF: predicated region fallthrough
CT: control target
= control target key end

     0   :  { %12 = vsyncpa [#allocation3], 0  ;;  %s1292_s0 = inlined_call_operand.vmem [shape: f32[256,9], index: 0, kind: input, shape index: {}]   ;;  %s1293_s1 = inlined_call_operand.vmem [shape: f32[24,9], index: 1, kind: input, shape index: {}]   ;;  %s1294_s2 = inlined_call_operand.vmem [shape: f32[24,1], index: 2, kind: input, shape index: {}]   ;;  %s1295_s3 = inlined_call_operand.vmem [shape: f32[24,24], index: 3, kind: input, shape index: {}]   ;;  %s1296_s4 = inlined_call_operand.vmem [shape: f32[24,1], index: 4, kind: input, shape index: {}]   ;;  %s1297_s5 = inlined_call_operand.vmem [shape: f32[9,24], index: 5, kind: input, shape index: {}]   ;;  %s1298_s6 = inlined_call_operand.vmem [shape: f32[9,1], index: 6, kind: input, shape index: {}]   ;;  %s1299_s7 = inlined_call_operand.hbm [shape: f32[9,256], index: 7, kind: output, shape index: {}]  }
   0x1   :  { %14 = vsyncpa [#allocation3 + $0x1], 0  ;;  %s1072_s24 = smov 0   ;;  %s1074_s25 = smov 0  }
   0x2   :  { %s1076_s26 = smov 0   ;;  %s1078_s27 = smov 0  }
   0x3 LB: > { %s1093_s28 = sadd.s32 4294967295, %s1022_s27   ;;  %s743_s29 = sadd.s32 4294967294, %s1022_s27   ;;  %s1022_s27 = sphi %s1078_s27, %s1307_s27   ;;  %s1018_s26 = sphi %s1076_s26, %s1306_s26   ;;  %s1014_s25 = sphi %s1074_s25, %s1305_s25   ;;  %s1010_s24 = sphi %s1072_s24, %s1304_s24  }
   0x4   : > { %s1097_s30 = sadd.s32 1, %s1022_s27   ;;  %s179_s8 = sadd.s32 1, %s1018_s26 }
   0x5   : > { %s176_s9 = ssub.s32 %s1022_s27, %s1097_s30  ;;  %p189_p0 = scmp.ne.s32.totalorder %s1018_s26, %s1014_s25 }
   0x6   : > { %p177_p1 = scmp.eq.s32.totalorder %s176_s9, 0  ;;  %p190_p2 = scmp.eq.s32.totalorder %s1093_s28, 1 }
   0x7   : > { %p195_p3 = scmp.ne.s32.totalorder %s1014_s25, %s1010_s24  ;;  %p196_p4 = scmp.eq.s32.totalorder %s743_s29, 1 }
   0x8   : > { %s1108_s10 = scalar_select %p177_p1, %s1018_s26, %s179_s8  }
   0x9   : > { %p1110_p5 = por %p190_p2, %p189_p0  ;;  %p1114_p6 = por %p196_p4, %p195_p3 }
   0xa   : > { %p746_p7 = scmp.ge.s32.totalorder %s1022_s27, 1  ;;  %p241_p8 = scmp.lt.s32.totalorder %s1022_s27, 3 }
   0xc   : > { %p242_p9 = pnand %p746_p7, %p241_p8 }
   0xd   : > { %s748_s13 = sshll.u32 (!%p242_p9), %s1093_s28, 4  ;;  %v1024_v0 = vmov (!%p242_p9), 0.0|0.0   ;;  %vm1025_vm0 = vmmov (!%p242_p9), 0   ;;  %v1026_v1 = vmov (!%p242_p9), 0.0   ;;  %v1027_v2 = vmov (!%p242_p9), 0   ;;  %v287_v3 = vld [vmem:[%s1294_s2] sm:$0xff] (!%p242_p9) }
   0xe   : > { %245 = sbr.rel (%p242_p9) target bundleno = 776 (0x308), region = 48  ;;  %873 = vmatprep.subr.bf16.mxu0 (!%p242_p9), %v1024_v0  ;;  %p274_p10 = scmp.lt.s32.totalorder (!%p242_p9), %s748_s13, 31  ;;  %840 = vmatprep.mubr.msk.f32.mxu0 (!%p242_p9), %vm1025_vm0, %v1026_v1  ;;  %v289_v4 = vld [vmem:[%s1294_s2 + $0x10] sm:$0xff] (!%p242_p9)  ;;  %vm351_vm1 = vcmask (!%p242_p9), 72704   ;;  %v288_v5 = vld [vmem:[%s1294_s2 + $0x8] sm:$0xff] (!%p242_p9)  ;;  %v305_v6 = vld [vmem:[%s1296_s4] sm:$0xff] (!%p242_p9) }
   0xf   : > { %958 = vset.pattern.permute.xlu0 (!%p242_p9), %v1027_v2  ;;  %959 = vset.pattern.permute.xlu1 (!%p242_p9), %v1027_v2  ;;  %vm1148_vm2 = vmpackc.low (!%p242_p9), %vm351_vm1, %vm351_vm1  ;;  %v306_v11 = vld [vmem:[%s1296_s4 + $0x8] sm:$0xff] (!%p242_p9)  ;;  %v307_v12 = vld [vmem:[%s1296_s4 + $0x10] sm:$0xff] (!%p242_p9)  ;;  %vm492_vm3 = vcmask (!%p242_p9), 195584   ;;  %s270_s22 = sand.u32 (!%p242_p9), 1, %s1014_s25   ;;  %s775_s9 = sshll.u32 (!%p242_p9), %s1093_s28, 7 }
  0x10   : > { %292 = vperm.xlu0 (!%p242_p9), %958, %v287_v3   ;;  %905 = vmatprep.subr.bf16.mxu1 (!%p242_p9), %v1024_v0  ;;  %v323_v15 = vld [vmem:[%s1298_s6] sm:$0xff] (!%p242_p9)  ;;  %v324_v16 = vld [vmem:[%s1298_s6 + $0x8] sm:$0x1] (!%p242_p9)  ;;  %v281_v38 = vld [vmem:[%s1293_s1 + $0x10] sm:$0xff] (!%p242_p9)  ;;  %s747_s23 = sshll.u32 (!%p242_p9), %s270_s22, 4  ;;  %s1249_s15 = scalar_lea.hbm (!%p242_p9), %s1299_s7, %s775_s9 }
  0x11   : > { %302 = vperm.xlu1 (!%p242_p9), %959, %v289_v4   ;;  %855 = vmatprep.mubr.msk.f32.mxu1 (!%p242_p9), %vm1025_vm0, %v1026_v1  ;;  %v279_v36 = vld [vmem:[%s1293_s1] sm:$0xff] (!%p242_p9)  ;;  %v280_v37 = vld [vmem:[%s1293_s1 + $0x8] sm:$0xff] (!%p242_p9)  ;;  %v284_v57 = vld [vmem:[%s1295_s3 + $0x10] sm:$0xff] (!%p242_p9)  ;;  %s272_s29 = scalar_lea.vmem (!%p242_p9), [#allocation2], %s747_s23  ;;  %s1251_s16 = scalar_lea.sflag (!%p242_p9), [#allocation3], %s270_s22 }
  0x12   : > { %v282_v55 = vld [vmem:[%s1295_s3] sm:$0xff] (!%p242_p9)  ;;  %v283_v56 = vld [vmem:[%s1295_s3 + $0x8] sm:$0xff] (!%p242_p9)  ;;  %s1028_s17 = smov (!%p242_p9), [#allocation2]  }
  0x13   : > { %v285_v58 = vld [vmem:[%s1297_s5] sm:$0xff] (!%p242_p9)  ;;  %s964_s18 = sshll.u32 (!%p242_p9), %s1028_s17, 4  ;;  %s965_s18 = int_to_ptr.vmem [resolvable:$false] %s964_s18 }
  0x14   : > { %297 = vperm.xlu0 (!%p242_p9), %958, %v288_v5   ;;  %s966_s19 = scalar_lea.vmem (!%p242_p9), %s965_s18, 512 }
  0x15   : > { %s1309_s13 = smov (!%p274_p10, %s748_s13), 31  ;;  %310 = vperm.xlu1 %959, %v305_v6  }
  0x16   : > { %s749_s20 = sshll.u32 %s1309_s13, 3 }
  0x17   : > { %s1142_s8 = scalar_lea.vmem %s1292_s0, %s749_s20 }
  0x18   : > { %v335_v7 = vld [vmem:[%s1142_s8] sm:$0xff]  ;;  %v336_v8 = vld [vmem:[%s1142_s8 + $0x8] sm:$0xff]  ;;  %v337_v13 = vld [vmem:[%s1142_s8 + $0x10] sm:$0xff]  ;;  %315 = vperm.xlu0 %958, %v306_v11  }
  0x19   : > { %v874_v10 = vpack.c.bf16 %v336_v8, %v335_v7  ;;  %v338_v14 = vld [vmem:[%s1142_s8 + $0x18] sm:$0xff]  ;;  %320 = vperm.xlu1 %959, %v307_v12   ;;  %v339_v18 = vld [vmem:[%s1142_s8 + $0x20] sm:$0xff]  ;;  %v340_v19 = vld [vmem:[%s1142_s8 + $0x28] sm:$0xff] }
  0x1a   : > { %v878_v17 = vpack.c.bf16 %v338_v14, %v337_v13  ;;  %v882_v20 = vpack.c.bf16 %v340_v19, %v339_v18  ;;  %v341_v21 = vld [vmem:[%s1142_s8 + $0x30] sm:$0xff]  ;;  %v342_v22 = vld [vmem:[%s1142_s8 + $0x38] sm:$0xff]  ;;  %v343_v24 = vld [vmem:[%s1142_s8 + $0x40] sm:$0xff] }
  0x1b   : > { %876 = vmatpush3.bf16.xpose.msk.msra.mxu0 %vm1148_vm2, %v874_v10  ;;  %v886_v23 = vpack.c.bf16 %v342_v22, %v341_v21  ;;  %v344_v25 = vld [vmem:[%s1142_s8 + $0x48] sm:$0xff]  ;;  %v345_v27 = vld [vmem:[%s1142_s8 + $0x50] sm:$0xff]  ;;  %v346_v28 = vld [vmem:[%s1142_s8 + $0x58] sm:$0xff] }
  0x1c   : > { %877 = vmatprep.subr.bf16.mxu0 %v1024_v0  ;;  %327 = vperm.xlu0 %958, %v323_v15   ;;  %v890_v26 = vpack.c.bf16 %v344_v25, %v343_v24  ;;  %v894_v29 = vpack.c.bf16 %v346_v28, %v345_v27  ;;  %v347_v30 = vld [vmem:[%s1142_s8 + $0x60] sm:$0xff]  ;;  %v348_v31 = vld [vmem:[%s1142_s8 + $0x68] sm:$0xff]  ;;  %v349_v33 = vld [vmem:[%s1142_s8 + $0x70] sm:$0xff] }
  0x1d   : > { %332 = vperm.xlu1 %959, %v324_v16   ;;  %v898_v32 = vpack.c.bf16 %v348_v31, %v347_v30  ;;  %v350_v34 = vld [vmem:[%s1142_s8 + $0x78] sm:$0xff]  ;;  %v286_v11 = vld [vmem:[%s1297_s5 + $0x8] sm:$0x1]  ;;  %s681_s8 = sshll.u32 %s272_s29, 4  ;;  %s1244_s8 = int_to_ptr.vmem [resolvable:$true] %s681_s8 }
  0x1e   : > { %v902_v35 = vpack.c.bf16 %v350_v34, %v349_v33  ;;  %s960_s28 = scalar_lea.vmem %s1244_s8, 256  ;;  %p967_p0 = scmp.lt.s32.totalorder %s1244_s8, %s965_s18 }
  0x1f   : > { %p961_p11 = scmp.ne.s32.totalorder %s1244_s8, %s960_s28  ;;  %p968_p1 = scmp.lt.s32.totalorder %s966_s19, %s960_s28 }
  0x21   : > { %p962_p12 = pnand %p961_p11, %p1110_p5  ;;  %p969_p2 = por %p968_p1, %p967_p0 }
  0x23   : > { %880 = vmatpush3.bf16.xpose.msk.msra.mxu0 %vm1148_vm2, %v878_v17  ;;  %p963_p13 = pneg %p962_p12 }
  0x24   : > { %881 = vmatprep.subr.bf16.mxu0 %v1024_v0 }
  0x25   : > { %p970_p3 = pnand %p969_p2, %p963_p13 }
  0x2b   : > { %884 = vmatpush3.bf16.xpose.msk.msra.mxu0 %vm1148_vm2, %v882_v20 }
  0x2c   : > { %885 = vmatprep.subr.bf16.mxu0 %v1024_v0 }
  0x33   : > { %888 = vmatpush3.bf16.xpose.msk.msra.mxu0 %vm1148_vm2, %v886_v23 }
  0x34   : > { %889 = vmatprep.subr.bf16.mxu0 %v1024_v0 }
  0x3b   : > { %892 = vmatpush3.bf16.xpose.msk.msra.mxu0 %vm1148_vm2, %v890_v26 }
  0x3c   : > { %893 = vmatprep.subr.bf16.mxu0 %v1024_v0 }
  0x43   : > { %896 = vmatpush3.bf16.xpose.msk.msra.mxu0 %vm1148_vm2, %v894_v29 }
  0x44   : > { %897 = vmatprep.subr.bf16.mxu0 %v1024_v0 }
  0x4b   : > { %900 = vmatpush3.bf16.xpose.msk.msra.mxu0 %vm1148_vm2, %v898_v32 }
  0x4c   : > { %901 = vmatprep.subr.bf16.mxu0 %v1024_v0 }
  0x53   : > { %904 = vmatpush3.bf16.xpose.msk.msra.mxu0 %vm1148_vm2, %v902_v35 }
  0x5a   : > { %841 = vmatmul.mubr.msk.f32.vlgmr.msra.gmra.mrb[0].mxu0 %vm351_vm1, %v279_v36 }
  0x5b   : > { %843 = vmatprep.mubr.msk.f32.mxu0 %vm1025_vm0, %v1026_v1 }
  0x5e   : > { %844 = vmatmul.mubr.msk.f32.gmra.mrb[2].mxu0 %vm351_vm1, %v280_v37 }
  0x5f   : > { %846 = vmatprep.mubr.msk.f32.mxu0 %vm1025_vm0, %v1026_v1 }
  0x62   : > { %847 = vmatmul.mubr.msk.f32.gmra.mrb[4].mxu0 %vm351_vm1, %v281_v38 }
  0x8f   : > { %v293_v39 = vpop.permute.xlu0 %292 }
  0x90   : > { %v303_v49 = vpop.permute.xlu1 %302 }
  0x93   : > { %v298_v43 = vpop.permute.xlu0 %297 }
  0x94   : > { %v311_v61 = vpop.permute.xlu1 %310 }
  0x97   : > { %v316_v63 = vpop.permute.xlu0 %315 }
  0x98   : > { %v321_v5 = vpop.permute.xlu1 %320 }
  0x9b   : > { %v328_v14 = vpop.permute.xlu0 %327 }
  0x9c   : > { %v333_v12 = vpop.permute.xlu1 %332 }
 0x12d   : > { %v475_v40 = vpop.f32.mrb[0].mxu0 }
 0x12e   : > { %v842_v41 = vpop.f32.mrb[1].mxu0  ;;  %v476_v42 = vadd.f32 %v475_v40, %v293_v39 }
 0x130   : > { %v489_v47 = vmax.f32 %v476_v42, 0.0 }
 0x131   : > { %v480_v44 = vpop.f32.mrb[2].mxu0 }
 0x132   : > { %v481_v45 = vadd.f32 %v480_v44, %v298_v43  ;;  %v845_v46 = vpop.f32.mrb[3].mxu0 }
 0x134   : > { %v490_v48 = vmax.f32 %v481_v45, 0.0 }
 0x135   : > { %v485_v50 = vpop.f32.mrb[4].mxu0 }
 0x136   : > { %v486_v51 = vadd.f32 %v485_v50, %v303_v49  ;;  %v848_v52 = vpop.f32.mrb[5].mxu0  ;;  %v906_v53 = vpack.c.bf16 %v490_v48, %v489_v47 }
 0x138   : > { %v491_v54 = vmax.f32 %v486_v51, 0.0  ;;  %907 = vmatpush3.bf16.msra.mxu1 %v906_v53 }
 0x139   : > { %853 = vmatprep.subr.mxu1 %v1026_v1 }
 0x13c   : > { %854 = vmatpush3.msra.mxu1 %v491_v54 }
 0x13d   : > { %856 = vmatmul.mubr.msk.f32.vlgmr.msra.gmra.mrb[0].mxu1 %vm492_vm3, %v282_v55 }
 0x13e   : > { %858 = vmatprep.mubr.msk.f32.mxu1 %vm1025_vm0, %v1026_v1 }
 0x141   : > { %859 = vmatmul.mubr.msk.f32.gmra.mrb[2].mxu1 %vm492_vm3, %v283_v56 }
 0x142   : > { %861 = vmatprep.mubr.msk.f32.mxu1 %vm1025_vm0, %v1026_v1 }
 0x145   : > { %862 = vmatmul.mubr.msk.f32.gmra.mrb[4].mxu1 %vm492_vm3, %v284_v57 }
 0x146   : > { %870 = vmatprep.mubr.msk.f32.mxu1 %vm492_vm3, %v285_v58 }
 0x210   : > { %v568_v59 = vpop.f32.mrb[0].mxu1 }
 0x211   : > { %v857_v60 = vpop.f32.mrb[1].mxu1  ;;  %v569_v62 = vadd.f32 %v568_v59, %v311_v61 }
 0x213   : > { %v582_v3 = vmax.f32 %v569_v62, 0.0 }
 0x214   : > { %v573_v0 = vpop.f32.mrb[2].mxu1 }
 0x215   : > { %v574_v2 = vadd.f32 %v573_v0, %v316_v63  ;;  %v860_v1 = vpop.f32.mrb[3].mxu1 }
 0x217   : > { %v583_v4 = vmax.f32 %v574_v2, 0.0 }
 0x218   : > { %v578_v6 = vpop.f32.mrb[4].mxu1 }
 0x219   : > { %v908_v7 = vpack.c.bf16 %v583_v4, %v582_v3  ;;  %v579_v8 = vadd.f32 %v578_v6, %v321_v5  ;;  %v863_v9 = vpop.f32.mrb[5].mxu1 }
 0x21b   : > { %v584_v10 = vmax.f32 %v579_v8, 0.0  ;;  %909 = vmatprep.subr.bf16.mxu1 %v908_v7 }
 0x21c   : > { %911 = vmatpush3.bf16.msra.mxu1 %v908_v7 }
 0x21d   : > { %868 = vmatprep.subr.mxu1 %v584_v10 }
 0x220   : > { %869 = vmatpush3.msra.mxu1 %v584_v10 }
 0x221   : > { %871 = vmatmul.mubr.msk.f32.vlgmr.msra.gmra.mrb[6].mxu1 %vm492_vm3, %v286_v11 }
 0x2f4   : > { %v872_v13 = vpop.f32.mrb[6].mxu1 }
 0x2f5   : > { %v663_v15 = vadd.f32 %v872_v13, %v333_v12  ;;  %v657_v16 = vpop.f32.mrb[7].mxu1 }
 0x2f6   : > { %v658_v17 = vadd.f32 %v657_v16, %v328_v14 }
 0x2f7   : > { %667 = vst [vmem:[%s272_s29 + $0x8] sm:$0x1] %v663_v15 }
 0x2f8   : > { %666 = vst [vmem:[%s272_s29] sm:$0xff] %v658_v17 }
 0x2f9   : > { %973 = shalt.err (!%p970_p3)
}
 0x2fa   : > { %s974_s20 = scalar_lea.hbm %s1249_s15, 256  ;;  %s978_s23 = scalar_lea.hbm %s1299_s7, 512 }
 0x2fb   : > { %p975_p4 = scmp.ne.s32.totalorder %s1249_s15, %s974_s20  ;;  %p979_p9 = scmp.lt.u32.totalorder %s1249_s15, %s1299_s7 }
 0x2fc   : > { %p980_p10 = scmp.lt.u32.totalorder %s978_s23, %s974_s20  ;;  %p982_p12 = scmp.lt.u32.totalorder %s974_s20, %s1249_s15 }
 0x2fd   : > { %p976_p7 = pnand %p975_p4, %p1110_p5 }
 0x2fe   : > { %p981_p11 = por %p980_p10, %p979_p9 }
 0x2ff   : > { %p977_p8 = pneg %p976_p7 }
 0x300   : > { %p983_p13 = por %p982_p12, %p981_p11 }
 0x302   : > { %p984_p0 = pnand %p983_p13, %p977_p8 }
 0x304   : > { %987 = shalt.err (!%p984_p0)
}
 0x305   : > { %s1029_s13 = smov 128   ;;  %s1030_s14 = smov 256  }
 0x306   : > { %s1031_s28 = smov 8  }
 0x307   : > { %912 = dma.vmem_to_hbm [thread:$0]  (%p1110_p5), %s1244_s8, 256, %s1249_s15, %s1251_s16, %s1029_s13, %s1030_s14, %s1031_s28  }
 0x308 PF: > { %p918_p1 = scmp.ge.s32.totalorder %s1022_s27, 2  ;;  %s696_s17 = sand.u32 1, %s1010_s24  }
 0x309   : > { %s697_s18 = scalar_lea.sflag [#allocation3], %s696_s17 }
 0x30a   : > { %p915_p2 = pnand %p918_p1, %p1114_p6 }
 0x30c   : > { %1005 = dma.done.wait (!%p915_p2), %s697_s18, 256  }
 0x30d   : > { %1007 = vsyncadd (!%p915_p2), %s697_s18, 4294967040  ;;  %p17_p3 = scmp.ge.s32.totalorder %s1097_s30, 4   ;;  %s1304_s24 = smov %s1014_s25 }
 0x30e   : > { %s1305_s25 = smov %s1018_s26  ;;  %s1306_s26 = smov %s1108_s10 }
 0x30f   : > { %s1307_s27 = smov %s1097_s30  ;;  %19 = sbr.rel (!%p17_p3) target bundleno = 3 (0x3), region = 83 }
 0x316   :  { %702 = vsyncpa [#allocation3], 1 }
 0x317   :  { %704 = vsyncpa [#allocation3 + $0x1], 1 }

</bundles_post_ra>
